<compile_context>
chip_gen: v6e
topology: v6e:2x2x1
jax: 0.10.0
libtpu: 0.0.40
codegen_flags: <defaults>
</compile_context>

<pallas_src>
import jax
import jax.numpy as jnp
from jax import lax
from jax.experimental import pallas as pl
from jax.experimental.pallas import tpu as pltpu


def _round_up(x, m):
    return ((x + m - 1) // m) * m


# ---------------------------------------------------------------------------
# Kernel 1: pointwise (1x1) conv (BN scale pre-folded into weights) + bias+ReLU
# ---------------------------------------------------------------------------
def _pw_conv_relu_kernel(x_ref, w_ref, b_ref, o_ref):
    acc = jnp.dot(x_ref[...], w_ref[...], preferred_element_type=jnp.float32)
    o_ref[...] = jnp.maximum(acc + b_ref[...], 0.0).astype(o_ref.dtype)


def pw_conv_relu(x2d, w_scaled, bias, *, tm=512):
    """x2d: (M, Cin) f32, w_scaled: (Cin, Cout) with BN scale folded in,
    bias: (1, Cout). Returns (M, Cout) f32."""
    M, cin = x2d.shape
    cout = w_scaled.shape[1]
    tm = min(tm, _round_up(M, 8))
    Mp = _round_up(M, tm)
    if Mp != M:  # padded tail instead of an M % tm assert
        x2d = jnp.pad(x2d, ((0, Mp - M), (0, 0)))

    out = pl.pallas_call(
        _pw_conv_relu_kernel,
        out_shape=jax.ShapeDtypeStruct((Mp, cout), jnp.float32),
        grid_spec=pltpu.PrefetchScalarGridSpec(
            num_scalar_prefetch=0,
            grid=(Mp // tm,),
            in_specs=[
                pl.BlockSpec((tm, cin), lambda i: (i, 0)),
                pl.BlockSpec((cin, cout), lambda i: (0, 0)),
                pl.BlockSpec((1, cout), lambda i: (0, 0)),
            ],
            out_specs=pl.BlockSpec((tm, cout), lambda i: (i, 0)),
        ),
        compiler_params=pltpu.CompilerParams(dimension_semantics=("parallel",)),
    )(x2d, w_scaled, bias)
    return out[:M] if Mp != M else out


# ---------------------------------------------------------------------------
# Kernel 2: fused [3x chained 5x5 max-pool] + cv2 (1x1 conv + BN + ReLU)
#   acc = x @ W2[0] + m(x) @ W2[1] + m(m(x)) @ W2[2] + m(m(m(x))) @ W2[3]
#   out = relu(acc + b2)        (never materializes the 4C concat in HBM)
# ---------------------------------------------------------------------------
def _sppf_pool_cv2_kernel(x_ref, w2_ref, b2_ref, o_ref, pad_ref, acc_ref):
    _, H, W, C = x_ref.shape
    cout = o_ref.shape[-1]
    K = 5

    # (-inf) border of the pooling scratch: only the 2-wide strips are written
    # each step (the center is fully overwritten by every pool call).
    pad_ref[0:2, :, :] = jnp.full((2, W + 4, C), -jnp.inf, jnp.float32)
    pad_ref[H + 2:H + 4, :, :] = jnp.full((2, W + 4, C), -jnp.inf, jnp.float32)
    pad_ref[2:H + 2, 0:2, :] = jnp.full((H, 2, C), -jnp.inf, jnp.float32)
    pad_ref[2:H + 2, W + 2:W + 4, :] = jnp.full((H, 2, C), -jnp.inf, jnp.float32)

    def pool(v):
        pad_ref[2:2 + H, 2:2 + W, :] = v
        p = pad_ref[...]
        # separable max: 5-wide max over rows (H axis), then over cols (W axis)
        rows = p[0:H]
        for di in range(1, K):
            rows = jnp.maximum(rows, p[di:di + H])
        out = rows[:, 0:W, :]
        for dj in range(1, K):
            out = jnp.maximum(out, rows[:, dj:dj + W, :])
        return out

    x = x_ref[0]                                        # (H, W, C)
    acc_ref[...] = jnp.dot(x.reshape(H * W, C), w2_ref[0],
                           preferred_element_type=jnp.float32)
    y = x
    for b in range(1, 4):
        y = pool(y)
        acc_ref[...] += jnp.dot(y.reshape(H * W, C), w2_ref[b],
                                preferred_element_type=jnp.float32)

    out = jnp.maximum(acc_ref[...] + b2_ref[...], 0.0)
    o_ref[0] = out.reshape(H, W, cout).astype(o_ref.dtype)


def sppf_pool_cv2(x_nhwc, w2_blocks, bias2):
    """x_nhwc: (N,H,W,C) f32; w2_blocks: (4, C, Cout) with BN scale folded in;
    bias2: (1, Cout). Returns (N, H, W, Cout) f32."""
    N, H, W, C = x_nhwc.shape
    cout = w2_blocks.shape[-1]
    return pl.pallas_call(
        _sppf_pool_cv2_kernel,
        out_shape=jax.ShapeDtypeStruct((N, H, W, cout), jnp.float32),
        grid_spec=pltpu.PrefetchScalarGridSpec(
            num_scalar_prefetch=0,
            grid=(N,),
            in_specs=[
                pl.BlockSpec((1, H, W, C), lambda n: (n, 0, 0, 0)),
                pl.BlockSpec((4, C, cout), lambda n: (0, 0, 0)),   # resident
                pl.BlockSpec((1, cout), lambda n: (0, 0)),         # resident
            ],
            out_specs=pl.BlockSpec((1, H, W, cout), lambda n: (n, 0, 0, 0)),
            scratch_shapes=[
                pltpu.VMEM((H + 4, W + 4, C), jnp.float32),   # padded pool buf
                pltpu.VMEM((H * W, cout), jnp.float32),       # cv2 accumulator
            ],
        ),
        compiler_params=pltpu.CompilerParams(dimension_semantics=("parallel",)),
    )(x_nhwc, w2_blocks, bias2)


# ---------------------------------------------------------------------------
# SimSPPF forward (wrapper glue in plain JAX)
# ---------------------------------------------------------------------------
def sim_sppf_forward(x_nchw, params):
    w1, s1, b1, w2, s2, b2 = params   # w*: (Cout, Cin) like PyTorch 1x1 conv weight
    N, Cin, H, W = x_nchw.shape
    c_ = w1.shape[0]
    cout = w2.shape[0]

    # One-time weight transform: fold BN scale into the 1x1 conv weights.
    w1s = (w1.T * s1[None, :]).astype(jnp.float32)                 # (Cin, c_)
    w2s = (w2.T * s2[None, :]).astype(jnp.float32).reshape(4, c_, cout)

    # TODO(synk): these two transposes disappear if the model stays NHWC.
    x = jnp.transpose(x_nchw, (0, 2, 3, 1)).reshape(N * H * W, Cin).astype(jnp.float32)

    # cv1
    x1 = pw_conv_relu(x, w1s, b1[None, :].astype(jnp.float32)).reshape(N, H, W, c_)
    # fused pool chain + cv2 (no 4C concat ever hits HBM)
    out = sppf_pool_cv2(x1, w2s, b2[None, :].astype(jnp.float32))
    return out.transpose(0, 3, 1, 2)


# ---------------------------------------------------------------------------
# Deterministic parameter init (conv has bias=False; BN fused to scale/bias)
# ---------------------------------------------------------------------------
def init_params(key, in_channels, out_channels):
    c_ = in_channels // 2
    eps = 1e-5
    ks = jax.random.split(key, 10)

    w1 = 0.5 * jax.random.normal(ks[0], (c_, in_channels), jnp.float32)
    g1 = jax.random.uniform(ks[1], (c_,), jnp.float32, 0.5, 1.5)
    be1 = 0.1 * jax.random.normal(ks[2], (c_,), jnp.float32)
    m1 = 0.1 * jax.random.normal(ks[3], (c_,), jnp.float32)
    v1 = jax.random.uniform(ks[4], (c_,), jnp.float32, 0.5, 1.5)
    s1 = g1 / jnp.sqrt(v1 + eps)
    b1 = be1 - m1 * s1

    w2 = 0.5 * jax.random.normal(ks[5], (out_channels, 4 * c_), jnp.float32)
    g2 = jax.random.uniform(ks[6], (out_channels,), jnp.float32, 0.5, 1.5)
    be2 = 0.1 * jax.random.normal(ks[7], (out_channels,), jnp.float32)
    m2 = 0.1 * jax.random.normal(ks[8], (out_channels,), jnp.float32)
    v2 = jax.random.uniform(ks[9], (out_channels,), jnp.float32, 0.5, 1.5)
    s2 = g2 / jnp.sqrt(v2 + eps)
    b2 = be2 - m2 * s2

    return (w1, s1, b1, w2, s2, b2)


# ---------------------------------------------------------------------------
# Pure-JAX reference (NCHW, like the PyTorch module)
# ---------------------------------------------------------------------------
def ref_sim_sppf(x, params):
    w1, s1, b1, w2, s2, b2 = params

    def pw(v, w, s, b):
        y = jnp.einsum('nchw,oc->nohw', v, w)
        y = y * s[None, :, None, None] + b[None, :, None, None]
        return jnp.maximum(y, 0.0)

    def mp(v):
        return lax.reduce_window(v, -jnp.inf, lax.max,
                                 (1, 1, 5, 5), (1, 1, 1, 1),
                                 ((0, 0), (0, 0), (2, 2), (2, 2)))

    x1 = pw(x, w1, s1, b1)
    y1 = mp(x1)
    y2 = mp(y1)
    y3 = mp(y2)
    return pw(jnp.concatenate([x1, y1, y2, y3], axis=1), w2, s2, b2)


if __name__ == "__main__":
    key = jax.random.PRNGKey(0)
    k_x, k_p = jax.random.split(key)

    N, Cin, H, W = 2, 4, 16, 16
    Cout = 8
    x = jax.random.normal(k_x, (N, Cin, H, W), jnp.float32)
    params = init_params(k_p, Cin, Cout)

    out = sim_sppf_forward(x, params)
    out = jax.block_until_ready(out)

    ref = ref_sim_sppf(x, params)
    assert out.shape == (N, Cout, H, W), out.shape
    assert jnp.allclose(out, ref, atol=1e-4, rtol=1e-4), float(jnp.max(jnp.abs(out - ref)))

    print("KERNEL_OK")
</pallas_src>

<mosaic_0001>
module attributes {stable_mosaic.version = 11 : i64} {
  func.func @_pw_conv_relu_kernel(%arg0: i32, %arg1: memref<512x4xf32, #tpu.memory_space<vmem>>, %arg2: memref<4x2xf32, #tpu.memory_space<vmem>>, %arg3: memref<1x2xf32, #tpu.memory_space<vmem>>, %arg4: memref<512x2xf32, #tpu.memory_space<vmem>>) attributes {dimension_semantics = [#tpu.dimension_semantics<parallel>], iteration_bounds = array<i64: 1>, scalar_prefetch = 0 : i64, scratch_operands = 0 : i64, tpu.core_type = #tpu.core_type<tc>, window_params = [{transform_indices = @transform_0, window_bounds = array<i64: 512, 4>}, {pipeline_mode = #tpu.pipeline_mode<synchronous>, transform_indices = @transform_1, window_bounds = array<i64: 4, 2>}, {pipeline_mode = #tpu.pipeline_mode<synchronous>, transform_indices = @transform_2, window_bounds = array<i64: 1, 2>}, {transform_indices = @transform_3, window_bounds = array<i64: 512, 2>}]} {
    %c0 = arith.constant 0 : index
    %c0_0 = arith.constant 0 : index
    %0 = vector.load %arg1[%c0, %c0_0] : memref<512x4xf32, #tpu.memory_space<vmem>>, vector<512x4xf32>
    %c0_1 = arith.constant 0 : index
    %c0_2 = arith.constant 0 : index
    %1 = vector.load %arg2[%c0_1, %c0_2] : memref<4x2xf32, #tpu.memory_space<vmem>>, vector<4x2xf32>
    %cst = arith.constant dense<0.000000e+00> : vector<512x2xf32>
    %2 = tpu.matmul %0, %1, %cst {dimension_numbers = #tpu.dot_dimension_numbers<[1], [0], [0], [1], [0, 0, 1, 1], [], []>} : vector<512x4xf32>, vector<4x2xf32>, vector<512x2xf32> -> vector<512x2xf32>
    %c0_3 = arith.constant 0 : index
    %c0_4 = arith.constant 0 : index
    %3 = vector.load %arg3[%c0_3, %c0_4] : memref<1x2xf32, #tpu.memory_space<vmem>>, vector<1x2xf32>
    %4 = vector.broadcast %3 : vector<1x2xf32> to vector<512x2xf32>
    %5 = arith.addf %2, %4 : vector<512x2xf32>
    %cst_5 = arith.constant 0.000000e+00 : f32
    %6 = vector.broadcast %cst_5 : f32 to vector<512x2xf32>
    %7 = arith.maximumf %5, %6 : vector<512x2xf32>
    %c0_6 = arith.constant 0 : index
    %c0_7 = arith.constant 0 : index
    %8 = vector.load %arg4[%c0_6, %c0_7] : memref<512x2xf32, #tpu.memory_space<vmem>>, vector<512x2xf32>
    tpu.vector_store %arg4[%c0_6, %c0_7], %7 {strides = array<i32>} : memref<512x2xf32, #tpu.memory_space<vmem>>, vector<512x2xf32>,
    return
  }
  func.func @transform_0(%arg0: i32) -> (i32, i32) {
    %c0_i32 = arith.constant 0 : i32
    %c0_i32_0 = arith.constant 0 : i32
    return %arg0, %c0_i32 : i32, i32
  }
  func.func @transform_1(%arg0: i32) -> (i32, i32) {
    %c0_i32 = arith.constant 0 : i32
    %c0_i32_0 = arith.constant 0 : i32
    %c0_i32_1 = arith.constant 0 : i32
    return %c0_i32, %c0_i32_0 : i32, i32
  }
  func.func @transform_2(%arg0: i32) -> (i32, i32) {
    %c0_i32 = arith.constant 0 : i32
    %c0_i32_0 = arith.constant 0 : i32
    %c0_i32_1 = arith.constant 0 : i32
    return %c0_i32, %c0_i32_0 : i32, i32
  }
  func.func @transform_3(%arg0: i32) -> (i32, i32) {
    %c0_i32 = arith.constant 0 : i32
    %c0_i32_0 = arith.constant 0 : i32
    return %arg0, %c0_i32 : i32, i32
  }
}

</mosaic_0001>

<bundles_post_ra>
// kernel: tpu_custom_call.1
= control target key start
LH: loop header
LB: loop body
LE: loop exit
PB: predicated region body
PF: predicated region fallthrough
CT: control target
= control target key end

     0   :  { %vm279_vm0 = vcmask 1043456   ;;  %vm86_vm1 = vcmask 31744   ;;  %vm732_vm2 = vcmask 15360   ;;  %s1636_s1 = inlined_call_operand.vmem [shape: f32[4,2], index: 1, kind: input, shape index: {}]   ;;  %s1637_s0 = inlined_call_operand.vmem [shape: f32[512,4], index: 0, kind: input, shape index: {}]   ;;  %s1638_s2 = inlined_call_operand.vmem [shape: f32[1,2], index: 2, kind: input, shape index: {}]   ;;  %s1639_s3 = inlined_call_operand.vmem [shape: f32[512,2], index: 3, kind: output, shape index: {}]  }
   0x1   :  { %v78_v0 = vld [vmem:[%s1636_s1] sm:$0xf]  ;;  %v15_v3 = vld [vmem:[%s1637_s0 + $0x8] sm:$0xff]  ;;  %v16_v5 = vld [vmem:[%s1637_s0 + $0x10] sm:$0xff] }
   0x2   :  { %v14_v1 = vld [vmem:[%s1637_s0] sm:$0xff]  ;;  %932 = vmatprep.subr.msk.mxu0 %vm279_vm0, %v78_v0  ;;  %1030 = vmatprep.subr.msk.mxu1 %vm279_vm0, %v78_v0  ;;  %v47_v4 = vld [vmem:[%s1637_s0 + $0x108] sm:$0xff]  ;;  %v48_v6 = vld [vmem:[%s1637_s0 + $0x110] sm:$0xff] }
   0x3   :  { %v46_v2 = vld [vmem:[%s1637_s0 + $0x100] sm:$0xff]  ;;  %933 = vmatpush3.msk.msra.mxu0 %vm279_vm0, %v78_v0  ;;  %1031 = vmatpush3.msk.msra.mxu1 %vm279_vm0, %v78_v0  ;;  %v17_v7 = vld [vmem:[%s1637_s0 + $0x18] sm:$0xff]  ;;  %v19_v11 = vld [vmem:[%s1637_s0 + $0x28] sm:$0xff] }
   0x4   :  { %934 = vmatprep.mubr.msk.f32.mxu0 %vm86_vm1, %v14_v1  ;;  %982 = vmatprep.mubr.msk.f32.mxu1 %vm86_vm1, %v46_v2  ;;  %v49_v8 = vld [vmem:[%s1637_s0 + $0x118] sm:$0xff]  ;;  %v18_v9 = vld [vmem:[%s1637_s0 + $0x20] sm:$0xff]  ;;  %v51_v12 = vld [vmem:[%s1637_s0 + $0x128] sm:$0xff] }
   0x5   :  { %935 = vmatmul.mubr.msk.f32.vlgmr.msra.gmra.mxu0 %vm86_vm1, %v15_v3  ;;  %983 = vmatmul.mubr.msk.f32.vlgmr.msra.gmra.mxu1 %vm86_vm1, %v47_v4  ;;  %v50_v10 = vld [vmem:[%s1637_s0 + $0x120] sm:$0xff]  ;;  %v20_v13 = vld [vmem:[%s1637_s0 + $0x30] sm:$0xff]  ;;  %v21_v15 = vld [vmem:[%s1637_s0 + $0x38] sm:$0xff] }
   0x6   :  { %937 = vmatprep.mubr.msk.f32.mxu0 %vm86_vm1, %v16_v5  ;;  %985 = vmatprep.mubr.msk.f32.mxu1 %vm86_vm1, %v48_v6  ;;  %v52_v14 = vld [vmem:[%s1637_s0 + $0x130] sm:$0xff]  ;;  %v53_v16 = vld [vmem:[%s1637_s0 + $0x138] sm:$0xff]  ;;  %v22_v17 = vld [vmem:[%s1637_s0 + $0x40] sm:$0xff] }
   0x7   :  { %v54_v18 = vld [vmem:[%s1637_s0 + $0x140] sm:$0xff]  ;;  %v23_v19 = vld [vmem:[%s1637_s0 + $0x48] sm:$0xff]  ;;  %v24_v21 = vld [vmem:[%s1637_s0 + $0x50] sm:$0xff] }
   0x8   :  { %v55_v20 = vld [vmem:[%s1637_s0 + $0x148] sm:$0xff]  ;;  %v56_v22 = vld [vmem:[%s1637_s0 + $0x150] sm:$0xff]  ;;  %v25_v23 = vld [vmem:[%s1637_s0 + $0x58] sm:$0xff] }
   0x9   :  { %938 = vmatmul.mubr.msk.f32.gmra.mxu0 %vm86_vm1, %v17_v7  ;;  %986 = vmatmul.mubr.msk.f32.gmra.mxu1 %vm86_vm1, %v49_v8  ;;  %v57_v24 = vld [vmem:[%s1637_s0 + $0x158] sm:$0xff]  ;;  %v26_v25 = vld [vmem:[%s1637_s0 + $0x60] sm:$0xff]  ;;  %v27_v27 = vld [vmem:[%s1637_s0 + $0x68] sm:$0xff] }
   0xa   :  { %940 = vmatprep.mubr.msk.f32.mxu0 %vm86_vm1, %v18_v9  ;;  %988 = vmatprep.mubr.msk.f32.mxu1 %vm86_vm1, %v50_v10  ;;  %v58_v26 = vld [vmem:[%s1637_s0 + $0x160] sm:$0xff]  ;;  %v59_v28 = vld [vmem:[%s1637_s0 + $0x168] sm:$0xff]  ;;  %v28_v29 = vld [vmem:[%s1637_s0 + $0x70] sm:$0xff] }
   0xb   :  { %v60_v30 = vld [vmem:[%s1637_s0 + $0x170] sm:$0xff]  ;;  %v29_v31 = vld [vmem:[%s1637_s0 + $0x78] sm:$0xff]  ;;  %v30_v33 = vld [vmem:[%s1637_s0 + $0x80] sm:$0xff] }
   0xc   :  { %v61_v32 = vld [vmem:[%s1637_s0 + $0x178] sm:$0xff]  ;;  %v62_v34 = vld [vmem:[%s1637_s0 + $0x180] sm:$0xff]  ;;  %v31_v35 = vld [vmem:[%s1637_s0 + $0x88] sm:$0xff] }
   0xd   :  { %941 = vmatmul.mubr.msk.f32.gmra.mxu0 %vm86_vm1, %v19_v11  ;;  %989 = vmatmul.mubr.msk.f32.gmra.mxu1 %vm86_vm1, %v51_v12  ;;  %v63_v36 = vld [vmem:[%s1637_s0 + $0x188] sm:$0xff]  ;;  %v32_v37 = vld [vmem:[%s1637_s0 + $0x90] sm:$0xff]  ;;  %v33_v39 = vld [vmem:[%s1637_s0 + $0x98] sm:$0xff] }
   0xe   :  { %943 = vmatprep.mubr.msk.f32.mxu0 %vm86_vm1, %v20_v13  ;;  %991 = vmatprep.mubr.msk.f32.mxu1 %vm86_vm1, %v52_v14  ;;  %v64_v38 = vld [vmem:[%s1637_s0 + $0x190] sm:$0xff]  ;;  %v65_v40 = vld [vmem:[%s1637_s0 + $0x198] sm:$0xff]  ;;  %v34_v41 = vld [vmem:[%s1637_s0 + $0xa0] sm:$0xff] }
   0xf   :  { %v66_v42 = vld [vmem:[%s1637_s0 + $0x1a0] sm:$0xff]  ;;  %v35_v43 = vld [vmem:[%s1637_s0 + $0xa8] sm:$0xff]  ;;  %v36_v45 = vld [vmem:[%s1637_s0 + $0xb0] sm:$0xff] }
  0x10   :  { %v67_v44 = vld [vmem:[%s1637_s0 + $0x1a8] sm:$0xff]  ;;  %v68_v46 = vld [vmem:[%s1637_s0 + $0x1b0] sm:$0xff]  ;;  %v37_v47 = vld [vmem:[%s1637_s0 + $0xb8] sm:$0xff] }
  0x11   :  { %944 = vmatmul.mubr.msk.f32.gmra.mxu0 %vm86_vm1, %v21_v15  ;;  %992 = vmatmul.mubr.msk.f32.gmra.mxu1 %vm86_vm1, %v53_v16  ;;  %v69_v48 = vld [vmem:[%s1637_s0 + $0x1b8] sm:$0xff]  ;;  %v38_v49 = vld [vmem:[%s1637_s0 + $0xc0] sm:$0xff]  ;;  %v39_v51 = vld [vmem:[%s1637_s0 + $0xc8] sm:$0xff] }
  0x12   :  { %946 = vmatprep.mubr.msk.f32.mxu0 %vm86_vm1, %v22_v17  ;;  %994 = vmatprep.mubr.msk.f32.mxu1 %vm86_vm1, %v54_v18  ;;  %v70_v50 = vld [vmem:[%s1637_s0 + $0x1c0] sm:$0xff]  ;;  %v71_v52 = vld [vmem:[%s1637_s0 + $0x1c8] sm:$0xff]  ;;  %v40_v53 = vld [vmem:[%s1637_s0 + $0xd0] sm:$0xff] }
  0x13   :  { %v72_v54 = vld [vmem:[%s1637_s0 + $0x1d0] sm:$0xff]  ;;  %v41_v55 = vld [vmem:[%s1637_s0 + $0xd8] sm:$0xff]  ;;  %v42_v57 = vld [vmem:[%s1637_s0 + $0xe0] sm:$0xff] }
  0x14   :  { %v73_v56 = vld [vmem:[%s1637_s0 + $0x1d8] sm:$0xff]  ;;  %v74_v58 = vld [vmem:[%s1637_s0 + $0x1e0] sm:$0xff]  ;;  %v43_v59 = vld [vmem:[%s1637_s0 + $0xe8] sm:$0xff] }
  0x15   :  { %947 = vmatmul.mubr.msk.f32.gmra.mxu0 %vm86_vm1, %v23_v19  ;;  %995 = vmatmul.mubr.msk.f32.gmra.mxu1 %vm86_vm1, %v55_v20  ;;  %v75_v60 = vld [vmem:[%s1637_s0 + $0x1e8] sm:$0xff]  ;;  %v44_v61 = vld [vmem:[%s1637_s0 + $0xf0] sm:$0xff]  ;;  %v45_v63 = vld [vmem:[%s1637_s0 + $0xf8] sm:$0xff] }
  0x16   :  { %949 = vmatprep.mubr.msk.f32.mxu0 %vm86_vm1, %v24_v21  ;;  %997 = vmatprep.mubr.msk.f32.mxu1 %vm86_vm1, %v56_v22  ;;  %v76_v62 = vld [vmem:[%s1637_s0 + $0x1f0] sm:$0xff]  ;;  %v77_v0 = vld [vmem:[%s1637_s0 + $0x1f8] sm:$0xff]  ;;  %v1314_v1 = vld [vmem:[%s1638_s2] ss:$0 sm:$0xff] }
  0x19   :  { %950 = vmatmul.mubr.msk.f32.gmra.mxu0 %vm86_vm1, %v25_v23  ;;  %998 = vmatmul.mubr.msk.f32.gmra.mxu1 %vm86_vm1, %v57_v24 }
  0x1a   :  { %952 = vmatprep.mubr.msk.f32.mxu0 %vm86_vm1, %v26_v25  ;;  %1000 = vmatprep.mubr.msk.f32.mxu1 %vm86_vm1, %v58_v26 }
  0x1d   :  { %953 = vmatmul.mubr.msk.f32.gmra.mxu0 %vm86_vm1, %v27_v27  ;;  %1001 = vmatmul.mubr.msk.f32.gmra.mxu1 %vm86_vm1, %v59_v28 }
  0x1e   :  { %955 = vmatprep.mubr.msk.f32.mxu0 %vm86_vm1, %v28_v29  ;;  %1003 = vmatprep.mubr.msk.f32.mxu1 %vm86_vm1, %v60_v30 }
  0x21   :  { %956 = vmatmul.mubr.msk.f32.gmra.mxu0 %vm86_vm1, %v29_v31  ;;  %1004 = vmatmul.mubr.msk.f32.gmra.mxu1 %vm86_vm1, %v61_v32 }
  0x22   :  { %958 = vmatprep.mubr.msk.f32.mxu0 %vm86_vm1, %v30_v33  ;;  %1006 = vmatprep.mubr.msk.f32.mxu1 %vm86_vm1, %v62_v34 }
  0x25   :  { %959 = vmatmul.mubr.msk.f32.gmra.mxu0 %vm86_vm1, %v31_v35  ;;  %1007 = vmatmul.mubr.msk.f32.gmra.mxu1 %vm86_vm1, %v63_v36 }
  0x26   :  { %961 = vmatprep.mubr.msk.f32.mxu0 %vm86_vm1, %v32_v37  ;;  %1009 = vmatprep.mubr.msk.f32.mxu1 %vm86_vm1, %v64_v38 }
  0x29   :  { %962 = vmatmul.mubr.msk.f32.gmra.mxu0 %vm86_vm1, %v33_v39  ;;  %1010 = vmatmul.mubr.msk.f32.gmra.mxu1 %vm86_vm1, %v65_v40 }
  0x2a   :  { %964 = vmatprep.mubr.msk.f32.mxu0 %vm86_vm1, %v34_v41  ;;  %1012 = vmatprep.mubr.msk.f32.mxu1 %vm86_vm1, %v66_v42 }
  0x2d   :  { %965 = vmatmul.mubr.msk.f32.gmra.mxu0 %vm86_vm1, %v35_v43  ;;  %1013 = vmatmul.mubr.msk.f32.gmra.mxu1 %vm86_vm1, %v67_v44 }
  0x2e   :  { %967 = vmatprep.mubr.msk.f32.mxu0 %vm86_vm1, %v36_v45  ;;  %1015 = vmatprep.mubr.msk.f32.mxu1 %vm86_vm1, %v68_v46 }
  0x31   :  { %968 = vmatmul.mubr.msk.f32.gmra.mxu0 %vm86_vm1, %v37_v47  ;;  %1016 = vmatmul.mubr.msk.f32.gmra.mxu1 %vm86_vm1, %v69_v48 }
  0x32   :  { %970 = vmatprep.mubr.msk.f32.mxu0 %vm86_vm1, %v38_v49  ;;  %1018 = vmatprep.mubr.msk.f32.mxu1 %vm86_vm1, %v70_v50 }
  0x35   :  { %971 = vmatmul.mubr.msk.f32.gmra.mxu0 %vm86_vm1, %v39_v51  ;;  %1019 = vmatmul.mubr.msk.f32.gmra.mxu1 %vm86_vm1, %v71_v52 }
  0x36   :  { %973 = vmatprep.mubr.msk.f32.mxu0 %vm86_vm1, %v40_v53  ;;  %1021 = vmatprep.mubr.msk.f32.mxu1 %vm86_vm1, %v72_v54 }
  0x39   :  { %974 = vmatmul.mubr.msk.f32.gmra.mxu0 %vm86_vm1, %v41_v55  ;;  %1022 = vmatmul.mubr.msk.f32.gmra.mxu1 %vm86_vm1, %v73_v56 }
  0x3a   :  { %976 = vmatprep.mubr.msk.f32.mxu0 %vm86_vm1, %v42_v57  ;;  %1024 = vmatprep.mubr.msk.f32.mxu1 %vm86_vm1, %v74_v58 }
  0x3d   :  { %977 = vmatmul.mubr.msk.f32.gmra.mxu0 %vm86_vm1, %v43_v59  ;;  %1025 = vmatmul.mubr.msk.f32.gmra.mxu1 %vm86_vm1, %v75_v60 }
  0x3e   :  { %979 = vmatprep.mubr.msk.f32.mxu0 %vm86_vm1, %v44_v61  ;;  %1027 = vmatprep.mubr.msk.f32.mxu1 %vm86_vm1, %v76_v62 }
  0x41   :  { %980 = vmatmul.mubr.msk.f32.gmra.mxu0 %vm86_vm1, %v45_v63  ;;  %1028 = vmatmul.mubr.msk.f32.gmra.mxu1 %vm86_vm1, %v77_v0 }
  0xc5   :  { %v936_v2 = vpop.f32.mrf.mxu0  ;;  %v984_v3 = vpop.f32.mrf.mxu1 }
  0xc6   :  { %v355_v4 = vadd.f32 %v936_v2, %v1314_v1  ;;  %v515_v5 = vadd.f32 %v984_v3, %v1314_v1 }
  0xc7   :  { %v349_v6 = vpop.f32.mrf.mxu0  ;;  %v509_v7 = vpop.f32.mrf.mxu1 }
  0xc8   :  { %v669_v8 = vmax.f32 %v355_v4, 0.0  ;;  %v701_v9 = vmax.f32 %v515_v5, 0.0  ;;  %v350_v10 = vadd.f32 %v1314_v1, %v349_v6  ;;  %v510_v11 = vadd.f32 %v1314_v1, %v509_v7 }
  0xc9   :  { %v939_v12 = vpop.f32.mrf.mxu0  ;;  %v987_v13 = vpop.f32.mrf.mxu1 }
  0xca   :  { %734 = vst.msk [vmem:[%s1639_s3 + $0x8] sm:$0xff] %vm732_vm2, %v669_v8  ;;  %766 = vst.msk [vmem:[%s1639_s3 + $0x108] sm:$0xff] %vm732_vm2, %v701_v9  ;;  %v668_v14 = vmax.f32 %v350_v10, 0.0  ;;  %v700_v15 = vmax.f32 %v510_v11, 0.0  ;;  %v365_v16 = vadd.f32 %v939_v12, %v1314_v1  ;;  %v525_v17 = vadd.f32 %v987_v13, %v1314_v1 }
  0xcb   :  { %v359_v18 = vpop.f32.mrf.mxu0  ;;  %v519_v19 = vpop.f32.mrf.mxu1 }
  0xcc   :  { %733 = vst.msk [vmem:[%s1639_s3] sm:$0xff] %vm732_vm2, %v668_v14  ;;  %765 = vst.msk [vmem:[%s1639_s3 + $0x100] sm:$0xff] %vm732_vm2, %v700_v15  ;;  %v671_v20 = vmax.f32 %v365_v16, 0.0  ;;  %v703_v21 = vmax.f32 %v525_v17, 0.0  ;;  %v360_v22 = vadd.f32 %v1314_v1, %v359_v18  ;;  %v520_v23 = vadd.f32 %v1314_v1, %v519_v19 }
  0xcd   :  { %v942_v24 = vpop.f32.mrf.mxu0  ;;  %v990_v25 = vpop.f32.mrf.mxu1 }
  0xce   :  { %736 = vst.msk [vmem:[%s1639_s3 + $0x18] sm:$0xff] %vm732_vm2, %v671_v20  ;;  %768 = vst.msk [vmem:[%s1639_s3 + $0x118] sm:$0xff] %vm732_vm2, %v703_v21  ;;  %v670_v26 = vmax.f32 %v360_v22, 0.0  ;;  %v702_v27 = vmax.f32 %v520_v23, 0.0  ;;  %v375_v28 = vadd.f32 %v942_v24, %v1314_v1  ;;  %v535_v29 = vadd.f32 %v990_v25, %v1314_v1 }
  0xcf   :  { %v369_v30 = vpop.f32.mrf.mxu0  ;;  %v529_v31 = vpop.f32.mrf.mxu1 }
  0xd0   :  { %735 = vst.msk [vmem:[%s1639_s3 + $0x10] sm:$0xff] %vm732_vm2, %v670_v26  ;;  %767 = vst.msk [vmem:[%s1639_s3 + $0x110] sm:$0xff] %vm732_vm2, %v702_v27  ;;  %v673_v32 = vmax.f32 %v375_v28, 0.0  ;;  %v705_v33 = vmax.f32 %v535_v29, 0.0  ;;  %v370_v34 = vadd.f32 %v1314_v1, %v369_v30  ;;  %v530_v35 = vadd.f32 %v1314_v1, %v529_v31 }
  0xd1   :  { %v945_v36 = vpop.f32.mrf.mxu0  ;;  %v993_v37 = vpop.f32.mrf.mxu1 }
  0xd2   :  { %738 = vst.msk [vmem:[%s1639_s3 + $0x28] sm:$0xff] %vm732_vm2, %v673_v32  ;;  %770 = vst.msk [vmem:[%s1639_s3 + $0x128] sm:$0xff] %vm732_vm2, %v705_v33  ;;  %v672_v38 = vmax.f32 %v370_v34, 0.0  ;;  %v704_v39 = vmax.f32 %v530_v35, 0.0  ;;  %v385_v40 = vadd.f32 %v945_v36, %v1314_v1  ;;  %v545_v41 = vadd.f32 %v993_v37, %v1314_v1 }
  0xd3   :  { %v379_v42 = vpop.f32.mrf.mxu0  ;;  %v539_v43 = vpop.f32.mrf.mxu1 }
  0xd4   :  { %737 = vst.msk [vmem:[%s1639_s3 + $0x20] sm:$0xff] %vm732_vm2, %v672_v38  ;;  %769 = vst.msk [vmem:[%s1639_s3 + $0x120] sm:$0xff] %vm732_vm2, %v704_v39  ;;  %v675_v44 = vmax.f32 %v385_v40, 0.0  ;;  %v707_v45 = vmax.f32 %v545_v41, 0.0  ;;  %v380_v46 = vadd.f32 %v1314_v1, %v379_v42  ;;  %v540_v47 = vadd.f32 %v1314_v1, %v539_v43 }
  0xd5   :  { %v948_v48 = vpop.f32.mrf.mxu0  ;;  %v996_v49 = vpop.f32.mrf.mxu1 }
  0xd6   :  { %740 = vst.msk [vmem:[%s1639_s3 + $0x38] sm:$0xff] %vm732_vm2, %v675_v44  ;;  %772 = vst.msk [vmem:[%s1639_s3 + $0x138] sm:$0xff] %vm732_vm2, %v707_v45  ;;  %v674_v50 = vmax.f32 %v380_v46, 0.0  ;;  %v706_v51 = vmax.f32 %v540_v47, 0.0  ;;  %v395_v52 = vadd.f32 %v948_v48, %v1314_v1  ;;  %v555_v53 = vadd.f32 %v996_v49, %v1314_v1 }
  0xd7   :  { %v389_v54 = vpop.f32.mrf.mxu0  ;;  %v549_v55 = vpop.f32.mrf.mxu1 }
  0xd8   :  { %739 = vst.msk [vmem:[%s1639_s3 + $0x30] sm:$0xff] %vm732_vm2, %v674_v50  ;;  %771 = vst.msk [vmem:[%s1639_s3 + $0x130] sm:$0xff] %vm732_vm2, %v706_v51  ;;  %v677_v56 = vmax.f32 %v395_v52, 0.0  ;;  %v709_v57 = vmax.f32 %v555_v53, 0.0  ;;  %v390_v58 = vadd.f32 %v1314_v1, %v389_v54  ;;  %v550_v59 = vadd.f32 %v1314_v1, %v549_v55 }
  0xd9   :  { %v951_v60 = vpop.f32.mrf.mxu0  ;;  %v999_v61 = vpop.f32.mrf.mxu1 }
  0xda   :  { %742 = vst.msk [vmem:[%s1639_s3 + $0x48] sm:$0xff] %vm732_vm2, %v677_v56  ;;  %774 = vst.msk [vmem:[%s1639_s3 + $0x148] sm:$0xff] %vm732_vm2, %v709_v57  ;;  %v676_v62 = vmax.f32 %v390_v58, 0.0  ;;  %v708_v63 = vmax.f32 %v550_v59, 0.0  ;;  %v405_v0 = vadd.f32 %v951_v60, %v1314_v1  ;;  %v565_v2 = vadd.f32 %v999_v61, %v1314_v1 }
  0xdb   :  { %v399_v3 = vpop.f32.mrf.mxu0  ;;  %v559_v4 = vpop.f32.mrf.mxu1 }
  0xdc   :  { %741 = vst.msk [vmem:[%s1639_s3 + $0x40] sm:$0xff] %vm732_vm2, %v676_v62  ;;  %773 = vst.msk [vmem:[%s1639_s3 + $0x140] sm:$0xff] %vm732_vm2, %v708_v63  ;;  %v679_v5 = vmax.f32 %v405_v0, 0.0  ;;  %v711_v6 = vmax.f32 %v565_v2, 0.0  ;;  %v400_v7 = vadd.f32 %v1314_v1, %v399_v3  ;;  %v560_v8 = vadd.f32 %v1314_v1, %v559_v4 }
  0xdd   :  { %v954_v9 = vpop.f32.mrf.mxu0  ;;  %v1002_v10 = vpop.f32.mrf.mxu1 }
  0xde   :  { %744 = vst.msk [vmem:[%s1639_s3 + $0x58] sm:$0xff] %vm732_vm2, %v679_v5  ;;  %776 = vst.msk [vmem:[%s1639_s3 + $0x158] sm:$0xff] %vm732_vm2, %v711_v6  ;;  %v678_v11 = vmax.f32 %v400_v7, 0.0  ;;  %v710_v12 = vmax.f32 %v560_v8, 0.0  ;;  %v415_v13 = vadd.f32 %v954_v9, %v1314_v1  ;;  %v575_v14 = vadd.f32 %v1002_v10, %v1314_v1 }
  0xdf   :  { %v409_v15 = vpop.f32.mrf.mxu0  ;;  %v569_v16 = vpop.f32.mrf.mxu1 }
  0xe0   :  { %743 = vst.msk [vmem:[%s1639_s3 + $0x50] sm:$0xff] %vm732_vm2, %v678_v11  ;;  %775 = vst.msk [vmem:[%s1639_s3 + $0x150] sm:$0xff] %vm732_vm2, %v710_v12  ;;  %v681_v17 = vmax.f32 %v415_v13, 0.0  ;;  %v713_v18 = vmax.f32 %v575_v14, 0.0  ;;  %v410_v19 = vadd.f32 %v1314_v1, %v409_v15  ;;  %v570_v20 = vadd.f32 %v1314_v1, %v569_v16 }
  0xe1   :  { %v957_v21 = vpop.f32.mrf.mxu0  ;;  %v1005_v22 = vpop.f32.mrf.mxu1 }
  0xe2   :  { %746 = vst.msk [vmem:[%s1639_s3 + $0x68] sm:$0xff] %vm732_vm2, %v681_v17  ;;  %778 = vst.msk [vmem:[%s1639_s3 + $0x168] sm:$0xff] %vm732_vm2, %v713_v18  ;;  %v680_v23 = vmax.f32 %v410_v19, 0.0  ;;  %v712_v24 = vmax.f32 %v570_v20, 0.0  ;;  %v425_v25 = vadd.f32 %v957_v21, %v1314_v1  ;;  %v585_v26 = vadd.f32 %v1005_v22, %v1314_v1 }
  0xe3   :  { %v419_v27 = vpop.f32.mrf.mxu0  ;;  %v579_v28 = vpop.f32.mrf.mxu1 }
  0xe4   :  { %745 = vst.msk [vmem:[%s1639_s3 + $0x60] sm:$0xff] %vm732_vm2, %v680_v23  ;;  %777 = vst.msk [vmem:[%s1639_s3 + $0x160] sm:$0xff] %vm732_vm2, %v712_v24  ;;  %v683_v29 = vmax.f32 %v425_v25, 0.0  ;;  %v715_v30 = vmax.f32 %v585_v26, 0.0  ;;  %v420_v31 = vadd.f32 %v1314_v1, %v419_v27  ;;  %v580_v32 = vadd.f32 %v1314_v1, %v579_v28 }
  0xe5   :  { %v960_v33 = vpop.f32.mrf.mxu0  ;;  %v1008_v34 = vpop.f32.mrf.mxu1 }
  0xe6   :  { %748 = vst.msk [vmem:[%s1639_s3 + $0x78] sm:$0xff] %vm732_vm2, %v683_v29  ;;  %780 = vst.msk [vmem:[%s1639_s3 + $0x178] sm:$0xff] %vm732_vm2, %v715_v30  ;;  %v682_v35 = vmax.f32 %v420_v31, 0.0  ;;  %v714_v36 = vmax.f32 %v580_v32, 0.0  ;;  %v435_v37 = vadd.f32 %v960_v33, %v1314_v1  ;;  %v595_v38 = vadd.f32 %v1008_v34, %v1314_v1 }
  0xe7   :  { %v429_v39 = vpop.f32.mrf.mxu0  ;;  %v589_v40 = vpop.f32.mrf.mxu1 }
  0xe8   :  { %747 = vst.msk [vmem:[%s1639_s3 + $0x70] sm:$0xff] %vm732_vm2, %v682_v35  ;;  %779 = vst.msk [vmem:[%s1639_s3 + $0x170] sm:$0xff] %vm732_vm2, %v714_v36  ;;  %v685_v41 = vmax.f32 %v435_v37, 0.0  ;;  %v717_v42 = vmax.f32 %v595_v38, 0.0  ;;  %v430_v43 = vadd.f32 %v1314_v1, %v429_v39  ;;  %v590_v44 = vadd.f32 %v1314_v1, %v589_v40 }
  0xe9   :  { %v963_v45 = vpop.f32.mrf.mxu0  ;;  %v1011_v46 = vpop.f32.mrf.mxu1 }
  0xea   :  { %750 = vst.msk [vmem:[%s1639_s3 + $0x88] sm:$0xff] %vm732_vm2, %v685_v41  ;;  %782 = vst.msk [vmem:[%s1639_s3 + $0x188] sm:$0xff] %vm732_vm2, %v717_v42  ;;  %v684_v47 = vmax.f32 %v430_v43, 0.0  ;;  %v716_v48 = vmax.f32 %v590_v44, 0.0  ;;  %v445_v49 = vadd.f32 %v963_v45, %v1314_v1  ;;  %v605_v50 = vadd.f32 %v1011_v46, %v1314_v1 }
  0xeb   :  { %v439_v51 = vpop.f32.mrf.mxu0  ;;  %v599_v52 = vpop.f32.mrf.mxu1 }
  0xec   :  { %749 = vst.msk [vmem:[%s1639_s3 + $0x80] sm:$0xff] %vm732_vm2, %v684_v47  ;;  %781 = vst.msk [vmem:[%s1639_s3 + $0x180] sm:$0xff] %vm732_vm2, %v716_v48  ;;  %v687_v53 = vmax.f32 %v445_v49, 0.0  ;;  %v719_v54 = vmax.f32 %v605_v50, 0.0  ;;  %v440_v55 = vadd.f32 %v1314_v1, %v439_v51  ;;  %v600_v56 = vadd.f32 %v1314_v1, %v599_v52 }
  0xed   :  { %v966_v57 = vpop.f32.mrf.mxu0  ;;  %v1014_v58 = vpop.f32.mrf.mxu1 }
  0xee   :  { %752 = vst.msk [vmem:[%s1639_s3 + $0x98] sm:$0xff] %vm732_vm2, %v687_v53  ;;  %784 = vst.msk [vmem:[%s1639_s3 + $0x198] sm:$0xff] %vm732_vm2, %v719_v54  ;;  %v686_v59 = vmax.f32 %v440_v55, 0.0  ;;  %v718_v60 = vmax.f32 %v600_v56, 0.0  ;;  %v455_v61 = vadd.f32 %v966_v57, %v1314_v1  ;;  %v615_v62 = vadd.f32 %v1014_v58, %v1314_v1 }
  0xef   :  { %v449_v63 = vpop.f32.mrf.mxu0  ;;  %v609_v0 = vpop.f32.mrf.mxu1 }
  0xf0   :  { %751 = vst.msk [vmem:[%s1639_s3 + $0x90] sm:$0xff] %vm732_vm2, %v686_v59  ;;  %783 = vst.msk [vmem:[%s1639_s3 + $0x190] sm:$0xff] %vm732_vm2, %v718_v60  ;;  %v689_v2 = vmax.f32 %v455_v61, 0.0  ;;  %v721_v3 = vmax.f32 %v615_v62, 0.0  ;;  %v450_v4 = vadd.f32 %v1314_v1, %v449_v63  ;;  %v610_v5 = vadd.f32 %v1314_v1, %v609_v0 }
  0xf1   :  { %v969_v6 = vpop.f32.mrf.mxu0  ;;  %v1017_v7 = vpop.f32.mrf.mxu1 }
  0xf2   :  { %754 = vst.msk [vmem:[%s1639_s3 + $0xa8] sm:$0xff] %vm732_vm2, %v689_v2  ;;  %786 = vst.msk [vmem:[%s1639_s3 + $0x1a8] sm:$0xff] %vm732_vm2, %v721_v3  ;;  %v688_v8 = vmax.f32 %v450_v4, 0.0  ;;  %v720_v9 = vmax.f32 %v610_v5, 0.0  ;;  %v465_v10 = vadd.f32 %v969_v6, %v1314_v1  ;;  %v625_v11 = vadd.f32 %v1017_v7, %v1314_v1 }
  0xf3   :  { %v459_v12 = vpop.f32.mrf.mxu0  ;;  %v619_v13 = vpop.f32.mrf.mxu1 }
  0xf4   :  { %753 = vst.msk [vmem:[%s1639_s3 + $0xa0] sm:$0xff] %vm732_vm2, %v688_v8  ;;  %785 = vst.msk [vmem:[%s1639_s3 + $0x1a0] sm:$0xff] %vm732_vm2, %v720_v9  ;;  %v691_v14 = vmax.f32 %v465_v10, 0.0  ;;  %v723_v15 = vmax.f32 %v625_v11, 0.0  ;;  %v460_v16 = vadd.f32 %v1314_v1, %v459_v12  ;;  %v620_v17 = vadd.f32 %v1314_v1, %v619_v13 }
  0xf5   :  { %v972_v18 = vpop.f32.mrf.mxu0  ;;  %v1020_v19 = vpop.f32.mrf.mxu1 }
  0xf6   :  { %756 = vst.msk [vmem:[%s1639_s3 + $0xb8] sm:$0xff] %vm732_vm2, %v691_v14  ;;  %788 = vst.msk [vmem:[%s1639_s3 + $0x1b8] sm:$0xff] %vm732_vm2, %v723_v15  ;;  %v690_v20 = vmax.f32 %v460_v16, 0.0  ;;  %v722_v21 = vmax.f32 %v620_v17, 0.0  ;;  %v475_v22 = vadd.f32 %v972_v18, %v1314_v1  ;;  %v635_v23 = vadd.f32 %v1020_v19, %v1314_v1 }
  0xf7   :  { %v469_v24 = vpop.f32.mrf.mxu0  ;;  %v629_v25 = vpop.f32.mrf.mxu1 }
  0xf8   :  { %755 = vst.msk [vmem:[%s1639_s3 + $0xb0] sm:$0xff] %vm732_vm2, %v690_v20  ;;  %787 = vst.msk [vmem:[%s1639_s3 + $0x1b0] sm:$0xff] %vm732_vm2, %v722_v21  ;;  %v693_v26 = vmax.f32 %v475_v22, 0.0  ;;  %v725_v27 = vmax.f32 %v635_v23, 0.0  ;;  %v470_v28 = vadd.f32 %v1314_v1, %v469_v24  ;;  %v630_v29 = vadd.f32 %v1314_v1, %v629_v25 }
  0xf9   :  { %v975_v30 = vpop.f32.mrf.mxu0  ;;  %v1023_v31 = vpop.f32.mrf.mxu1 }
  0xfa   :  { %758 = vst.msk [vmem:[%s1639_s3 + $0xc8] sm:$0xff] %vm732_vm2, %v693_v26  ;;  %790 = vst.msk [vmem:[%s1639_s3 + $0x1c8] sm:$0xff] %vm732_vm2, %v725_v27  ;;  %v692_v32 = vmax.f32 %v470_v28, 0.0  ;;  %v724_v33 = vmax.f32 %v630_v29, 0.0  ;;  %v485_v34 = vadd.f32 %v975_v30, %v1314_v1  ;;  %v645_v35 = vadd.f32 %v1023_v31, %v1314_v1 }
  0xfb   :  { %v479_v36 = vpop.f32.mrf.mxu0  ;;  %v639_v37 = vpop.f32.mrf.mxu1 }
  0xfc   :  { %757 = vst.msk [vmem:[%s1639_s3 + $0xc0] sm:$0xff] %vm732_vm2, %v692_v32  ;;  %789 = vst.msk [vmem:[%s1639_s3 + $0x1c0] sm:$0xff] %vm732_vm2, %v724_v33  ;;  %v695_v38 = vmax.f32 %v485_v34, 0.0  ;;  %v727_v39 = vmax.f32 %v645_v35, 0.0  ;;  %v480_v40 = vadd.f32 %v1314_v1, %v479_v36  ;;  %v640_v41 = vadd.f32 %v1314_v1, %v639_v37 }
  0xfd   :  { %v978_v42 = vpop.f32.mrf.mxu0  ;;  %v1026_v43 = vpop.f32.mrf.mxu1 }
  0xfe   :  { %760 = vst.msk [vmem:[%s1639_s3 + $0xd8] sm:$0xff] %vm732_vm2, %v695_v38  ;;  %792 = vst.msk [vmem:[%s1639_s3 + $0x1d8] sm:$0xff] %vm732_vm2, %v727_v39  ;;  %v694_v44 = vmax.f32 %v480_v40, 0.0  ;;  %v726_v45 = vmax.f32 %v640_v41, 0.0  ;;  %v495_v46 = vadd.f32 %v978_v42, %v1314_v1  ;;  %v655_v47 = vadd.f32 %v1026_v43, %v1314_v1 }
  0xff   :  { %v489_v48 = vpop.f32.mrf.mxu0  ;;  %v649_v49 = vpop.f32.mrf.mxu1 }
 0x100   :  { %759 = vst.msk [vmem:[%s1639_s3 + $0xd0] sm:$0xff] %vm732_vm2, %v694_v44  ;;  %791 = vst.msk [vmem:[%s1639_s3 + $0x1d0] sm:$0xff] %vm732_vm2, %v726_v45  ;;  %v697_v50 = vmax.f32 %v495_v46, 0.0  ;;  %v729_v51 = vmax.f32 %v655_v47, 0.0  ;;  %v490_v52 = vadd.f32 %v1314_v1, %v489_v48  ;;  %v650_v53 = vadd.f32 %v1314_v1, %v649_v49 }
 0x101   :  { %v981_v54 = vpop.f32.mrf.mxu0  ;;  %v1029_v55 = vpop.f32.mrf.mxu1 }
 0x102   :  { %762 = vst.msk [vmem:[%s1639_s3 + $0xe8] sm:$0xff] %vm732_vm2, %v697_v50  ;;  %794 = vst.msk [vmem:[%s1639_s3 + $0x1e8] sm:$0xff] %vm732_vm2, %v729_v51  ;;  %v696_v56 = vmax.f32 %v490_v52, 0.0  ;;  %v728_v57 = vmax.f32 %v650_v53, 0.0  ;;  %v505_v58 = vadd.f32 %v981_v54, %v1314_v1  ;;  %v665_v59 = vadd.f32 %v1029_v55, %v1314_v1 }
 0x103   :  { %v499_v60 = vpop.f32.mrf.mxu0  ;;  %v659_v61 = vpop.f32.mrf.mxu1 }
 0x104   :  { %761 = vst.msk [vmem:[%s1639_s3 + $0xe0] sm:$0xff] %vm732_vm2, %v696_v56  ;;  %793 = vst.msk [vmem:[%s1639_s3 + $0x1e0] sm:$0xff] %vm732_vm2, %v728_v57  ;;  %v699_v62 = vmax.f32 %v505_v58, 0.0  ;;  %v731_v63 = vmax.f32 %v665_v59, 0.0  ;;  %v500_v0 = vadd.f32 %v1314_v1, %v499_v60  ;;  %v660_v2 = vadd.f32 %v1314_v1, %v659_v61 }
 0x106   :  { %764 = vst.msk [vmem:[%s1639_s3 + $0xf8] sm:$0xff] %vm732_vm2, %v699_v62  ;;  %796 = vst.msk [vmem:[%s1639_s3 + $0x1f8] sm:$0xff] %vm732_vm2, %v731_v63  ;;  %v698_v3 = vmax.f32 %v500_v0, 0.0  ;;  %v730_v4 = vmax.f32 %v660_v2, 0.0 }
 0x108   :  { %763 = vst.msk [vmem:[%s1639_s3 + $0xf0] sm:$0xff] %vm732_vm2, %v698_v3  ;;  %795 = vst.msk [vmem:[%s1639_s3 + $0x1f0] sm:$0xff] %vm732_vm2, %v730_v4 }

</bundles_post_ra>
